<compile_context>
chip_gen: v6e
topology: v6e:2x2x1
jax: 0.10.0
libtpu: 0.0.40
codegen_flags: <defaults>
</compile_context>

<pallas_src>
import jax
import jax.numpy as jnp
import numpy as np
from jax import lax
from jax.experimental import pallas as pl
from jax.experimental.pallas import tpu as pltpu


def _round_up(a, b):
    return (a + b - 1) // b * b


def hgat_fused_kernel(x_ref, emb_ref, idx_ref, wl_ref, wr_ref, b_ref, out_ref):
    n_pad, c_pad = x_ref.shape
    k_emb = emb_ref.shape[0]
    e_pad = idx_ref.shape[1]

    # Edge metadata (int32), one row each: src, dst, edge_weight.
    src_row = idx_ref[0:1, :]          # (1, E)
    dst_row = idx_ref[1:2, :]          # (1, E)
    ew_row = idx_ref[2:3, :]           # (1, E)

    x_bf = x_ref[...]                  # (N, C) bf16
    emb_bf = emb_ref[...]              # (K, C) bf16

    node_iota = lax.broadcasted_iota(jnp.int32, (n_pad, e_pad), 0)
    emb_iota = lax.broadcasted_iota(jnp.int32, (k_emb, e_pad), 0)

    # One-hot gather/scatter matrices (0/1 are exact in bf16).
    src_oh = (node_iota == src_row).astype(jnp.bfloat16)   # (N, E): [src[e]==n]
    dst_oh = (node_iota == dst_row).astype(jnp.bfloat16)   # (N, E): [dst[e]==n]
    emb_oh = (emb_iota == ew_row).astype(jnp.bfloat16)     # (K, E): [ew[e]==k]

    # Gathers as transposed-LHS MXU matmuls (contract dim 0 of both operands):
    #   x[src[e]]              -> (E, C)
    #   edge_EMB[edge_weight]  -> (E, C)
    tdims = (((0,), (0,)), ((), ()))
    x_src = lax.dot_general(src_oh, x_bf, tdims,
                            preferred_element_type=jnp.float32)
    emb_e = lax.dot_general(emb_oh, emb_bf, tdims,
                            preferred_element_type=jnp.float32)

    # Message + scatter-sum over destination nodes.  Padded edges have
    # dst == n_pad (out of iota range) so their dst_oh column is all-zero.
    msgs = (emb_e * x_src).astype(jnp.bfloat16)                          # (E, C)
    prop = jnp.dot(dst_oh, msgs, preferred_element_type=jnp.float32)     # (N, C)

    # Update: x @ Wl^T + prop @ Wr^T + (b_l + b_r), accumulated in f32.
    out = (jnp.dot(x_bf, wl_ref[...], preferred_element_type=jnp.float32)
           + jnp.dot(prop.astype(jnp.bfloat16), wr_ref[...],
                     preferred_element_type=jnp.float32)
           + b_ref[...])
    out_ref[...] = out.astype(out_ref.dtype)


def h_gat_forward(x, edge_index, edge_weight, params):
    """x: [N, C] f32, edge_index: [2, E] int32 (row0=src, row1=dst),
    edge_weight: [E] int32 in [0, 10)."""
    N, C = x.shape
    E = edge_index.shape[1]
    C_out, C_in = params["w_l"].shape
    assert C_in == C and C_out == C, (
        "GraphConv's edge_EMB * x_j product requires in_channels == out_channels")

    LANE, SUB = 128, 8
    n_pad = _round_up(N, SUB)
    c_pad = _round_up(max(C, C_out), LANE)
    e_pad = _round_up(E, LANE)
    k_emb = params["edge_emb"].shape[0]
    k_pad = _round_up(k_emb, SUB)

    bf16, f32 = jnp.bfloat16, jnp.float32

    # Zero-padded bf16 node features and embedding table (padding contributes zeros).
    x_p = jnp.zeros((n_pad, c_pad), bf16).at[:N, :C].set(x.astype(bf16))
    emb_p = jnp.zeros((k_pad, c_pad), bf16).at[:k_emb, :C_out].set(
        params["edge_emb"].astype(bf16))

    # Edge metadata packed into one int32 VMEM block: rows 0=src, 1=dst, 2=weight.
    # Padded edges get dst = n_pad (out of range) so they scatter nowhere.
    idx_p = jnp.zeros((SUB, e_pad), jnp.int32)
    idx_p = idx_p.at[1, :].set(jnp.int32(n_pad))
    idx_p = idx_p.at[0, :E].set(edge_index[0].astype(jnp.int32))
    idx_p = idx_p.at[1, :E].set(edge_index[1].astype(jnp.int32))
    idx_p = idx_p.at[2, :E].set(edge_weight.astype(jnp.int32))

    # Pre-transposed bf16 weights and pre-summed f32 bias.
    wl_p = jnp.zeros((c_pad, c_pad), bf16).at[:C, :C_out].set(
        params["w_l"].T.astype(bf16))
    wr_p = jnp.zeros((c_pad, c_pad), bf16).at[:C, :C_out].set(
        params["w_r"].T.astype(bf16))
    b_p = jnp.zeros((1, c_pad), f32).at[0, :C_out].set(
        (params["b_l"] + params["b_r"]).astype(f32))

    full = lambda shape: pl.BlockSpec(shape, lambda: (0,) * len(shape))

    flops = 2 * (e_pad * n_pad * c_pad          # src gather matmul
                 + e_pad * k_pad * c_pad        # edge-embedding gather matmul
                 + n_pad * e_pad * c_pad        # scatter-sum matmul
                 + 2 * n_pad * c_pad * c_pad)   # two linear matmuls
    bytes_accessed = (2 * (x_p.size + emb_p.size + wl_p.size + wr_p.size)
                      + 4 * (idx_p.size + b_p.size + n_pad * c_pad))

    out_p = pl.pallas_call(
        hgat_fused_kernel,
        out_shape=jax.ShapeDtypeStruct((n_pad, c_pad), jnp.float32),
        in_specs=[
            full((n_pad, c_pad)),        # x (padded, bf16)
            full((k_pad, c_pad)),        # edge_EMB table (padded, bf16)
            full((SUB, e_pad)),          # packed src / dst / edge_weight (int32)
            full((c_pad, c_pad)),        # Wl^T (bf16)
            full((c_pad, c_pad)),        # Wr^T (bf16)
            full((1, c_pad)),            # b_l + b_r (f32)
        ],
        out_specs=full((n_pad, c_pad)),
        cost_estimate=pl.CostEstimate(flops=flops, transcendentals=0,
                                      bytes_accessed=bytes_accessed),
    )(x_p, emb_p, idx_p, wl_p, wr_p, b_p)

    return out_p[:N, :C_out]


def reference_forward(x, edge_index, edge_weight, params):
    """Pure-JAX f32 reference of the same GraphConv semantics."""
    N, C = x.shape
    src, dst = edge_index[0], edge_index[1]
    msgs = params["edge_emb"][edge_weight] * x[src]
    prop = jax.ops.segment_sum(msgs, dst, num_segments=N)
    return (x @ params["w_l"].T + params["b_l"]
            + prop @ params["w_r"].T + params["b_r"])


def init_params(key, in_channels, out_channels):
    k1, k2, k3, k4, k5 = jax.random.split(key, 5)
    bound = 1.0 / np.sqrt(in_channels)
    return {
        "w_l": jax.random.uniform(k1, (out_channels, in_channels), jnp.float32, -bound, bound),
        "b_l": jax.random.uniform(k2, (out_channels,), jnp.float32, -bound, bound),
        "w_r": jax.random.uniform(k3, (out_channels, in_channels), jnp.float32, -bound, bound),
        "b_r": jax.random.uniform(k4, (out_channels,), jnp.float32, -bound, bound),
        # nn.Embedding(10, out_channels) with uniform_ init
        "edge_emb": jax.random.uniform(k5, (10, out_channels), jnp.float32, 0.0, 1.0),
        # TODO(synk): lin_c and the Seq_Encoder_ATT / plan_GNN / other_GNN branches are
        # dead code after the early `return` in H_GAT.forward and are not implemented.
    }


if __name__ == "__main__":
    key = jax.random.PRNGKey(0)
    k_x, k_src, k_dst, k_w, k_p = jax.random.split(key, 5)

    N, C, E = 16, 32, 48           # in_channels == out_channels (required by module math)
    x = jax.random.normal(k_x, (N, C), jnp.float32)
    src = jax.random.randint(k_src, (E,), 0, N, jnp.int32)
    dst = jax.random.randint(k_dst, (E,), 0, N, jnp.int32)
    edge_index = jnp.stack([src, dst], axis=0)       # [2, E]
    edge_weight = jax.random.randint(k_w, (E,), 0, 10, jnp.int32)
    cat_list = jnp.zeros((N,), jnp.int32)            # unused: dead code in H_GAT.forward

    params = init_params(k_p, C, C)

    out = h_gat_forward(x, edge_index, edge_weight, params)
    out = jax.block_until_ready(out)

    ref = reference_forward(x, edge_index, edge_weight, params)
    # bf16 MXU operands with f32 accumulation -> loosened tolerance vs f32 reference.
    np.testing.assert_allclose(np.asarray(out), np.asarray(ref), rtol=5e-2, atol=5e-2)

    print("KERNEL_OK")
</pallas_src>

<mosaic_0001>
module attributes {stable_mosaic.version = 11 : i64} {
  func.func @hgat_fused_kernel(%arg0: memref<16x128xbf16, #tpu.memory_space<vmem>>, %arg1: memref<16x128xbf16, #tpu.memory_space<vmem>>, %arg2: memref<8x128xi32, #tpu.memory_space<vmem>>, %arg3: memref<128x128xbf16, #tpu.memory_space<vmem>>, %arg4: memref<128x128xbf16, #tpu.memory_space<vmem>>, %arg5: memref<1x128xf32, #tpu.memory_space<vmem>>, %arg6: memref<16x128xf32, #tpu.memory_space<vmem>>) attributes {dimension_semantics = [], scalar_prefetch = 0 : i64, scratch_operands = 0 : i64, tpu.core_type = #tpu.core_type<tc>} {
    %c0 = arith.constant 0 : index
    %c0_0 = arith.constant 0 : index
    %0 = vector.load %arg2[%c0, %c0_0] : memref<8x128xi32, #tpu.memory_space<vmem>>, vector<1x128xi32>
    %c1 = arith.constant 1 : index
    %c0_1 = arith.constant 0 : index
    %1 = vector.load %arg2[%c1, %c0_1] : memref<8x128xi32, #tpu.memory_space<vmem>>, vector<1x128xi32>
    %c2 = arith.constant 2 : index
    %c0_2 = arith.constant 0 : index
    %2 = vector.load %arg2[%c2, %c0_2] : memref<8x128xi32, #tpu.memory_space<vmem>>, vector<1x128xi32>
    %c0_3 = arith.constant 0 : index
    %c0_4 = arith.constant 0 : index
    %3 = vector.load %arg0[%c0_3, %c0_4] : memref<16x128xbf16, #tpu.memory_space<vmem>>, vector<16x128xbf16>
    %c0_5 = arith.constant 0 : index
    %c0_6 = arith.constant 0 : index
    %4 = vector.load %arg1[%c0_5, %c0_6] : memref<16x128xbf16, #tpu.memory_space<vmem>>, vector<16x128xbf16>
    %5 = tpu.iota {dimensions = array<i32: 0>} : vector<16x128xi32>
    %6 = tpu.iota {dimensions = array<i32: 0>} : vector<16x128xi32>
    %7 = vector.broadcast %0 : vector<1x128xi32> to vector<16x128xi32>
    %8 = arith.cmpi eq, %5, %7 : vector<16x128xi32>
    %9 = arith.extui %8 : vector<16x128xi1> to vector<16x128xi32>
    %10 = arith.sitofp %9 : vector<16x128xi32> to vector<16x128xf32>
    %11 = arith.truncf %10 : vector<16x128xf32> to vector<16x128xbf16>
    %12 = vector.broadcast %1 : vector<1x128xi32> to vector<16x128xi32>
    %13 = arith.cmpi eq, %5, %12 : vector<16x128xi32>
    %14 = arith.extui %13 : vector<16x128xi1> to vector<16x128xi32>
    %15 = arith.sitofp %14 : vector<16x128xi32> to vector<16x128xf32>
    %16 = arith.truncf %15 : vector<16x128xf32> to vector<16x128xbf16>
    %17 = vector.broadcast %2 : vector<1x128xi32> to vector<16x128xi32>
    %18 = arith.cmpi eq, %6, %17 : vector<16x128xi32>
    %19 = arith.extui %18 : vector<16x128xi1> to vector<16x128xi32>
    %20 = arith.sitofp %19 : vector<16x128xi32> to vector<16x128xf32>
    %21 = arith.truncf %20 : vector<16x128xf32> to vector<16x128xbf16>
    %cst = arith.constant dense<0.000000e+00> : vector<128x128xf32>
    %22 = tpu.matmul %11, %3, %cst {dimension_numbers = #tpu.dot_dimension_numbers<[0], [0], [1], [1], [0, 1, 1, 1], [], []>} : vector<16x128xbf16>, vector<16x128xbf16>, vector<128x128xf32> -> vector<128x128xf32>
    %cst_7 = arith.constant dense<0.000000e+00> : vector<128x128xf32>
    %23 = tpu.matmul %21, %4, %cst_7 {dimension_numbers = #tpu.dot_dimension_numbers<[0], [0], [1], [1], [0, 1, 1, 1], [], []>} : vector<16x128xbf16>, vector<16x128xbf16>, vector<128x128xf32> -> vector<128x128xf32>
    %24 = arith.mulf %23, %22 : vector<128x128xf32>
    %25 = arith.truncf %24 : vector<128x128xf32> to vector<128x128xbf16>
    %cst_8 = arith.constant dense<0.000000e+00> : vector<16x128xf32>
    %26 = tpu.matmul %16, %25, %cst_8 {dimension_numbers = #tpu.dot_dimension_numbers<[1], [0], [0], [1], [0, 0, 1, 1], [], []>} : vector<16x128xbf16>, vector<128x128xbf16>, vector<16x128xf32> -> vector<16x128xf32>
    %c0_9 = arith.constant 0 : index
    %c0_10 = arith.constant 0 : index
    %27 = vector.load %arg3[%c0_9, %c0_10] : memref<128x128xbf16, #tpu.memory_space<vmem>>, vector<128x128xbf16>
    %cst_11 = arith.constant dense<0.000000e+00> : vector<16x128xf32>
    %28 = tpu.matmul %3, %27, %cst_11 {dimension_numbers = #tpu.dot_dimension_numbers<[1], [0], [0], [1], [0, 0, 1, 1], [], []>} : vector<16x128xbf16>, vector<128x128xbf16>, vector<16x128xf32> -> vector<16x128xf32>
    %29 = arith.truncf %26 : vector<16x128xf32> to vector<16x128xbf16>
    %c0_12 = arith.constant 0 : index
    %c0_13 = arith.constant 0 : index
    %30 = vector.load %arg4[%c0_12, %c0_13] : memref<128x128xbf16, #tpu.memory_space<vmem>>, vector<128x128xbf16>
    %cst_14 = arith.constant dense<0.000000e+00> : vector<16x128xf32>
    %31 = tpu.matmul %29, %30, %cst_14 {dimension_numbers = #tpu.dot_dimension_numbers<[1], [0], [0], [1], [0, 0, 1, 1], [], []>} : vector<16x128xbf16>, vector<128x128xbf16>, vector<16x128xf32> -> vector<16x128xf32>
    %32 = arith.addf %28, %31 : vector<16x128xf32>
    %c0_15 = arith.constant 0 : index
    %c0_16 = arith.constant 0 : index
    %33 = vector.load %arg5[%c0_15, %c0_16] : memref<1x128xf32, #tpu.memory_space<vmem>>, vector<1x128xf32>
    %34 = vector.broadcast %33 : vector<1x128xf32> to vector<16x128xf32>
    %35 = arith.addf %32, %34 : vector<16x128xf32>
    %c0_17 = arith.constant 0 : index
    %c0_18 = arith.constant 0 : index
    %36 = vector.load %arg6[%c0_17, %c0_18] : memref<16x128xf32, #tpu.memory_space<vmem>>, vector<16x128xf32>
    tpu.vector_store %arg6[%c0_17, %c0_18], %35 {strides = array<i32>} : memref<16x128xf32, #tpu.memory_space<vmem>>, vector<16x128xf32>,
    return
  }
}

</mosaic_0001>

<bundles_post_ra>
// kernel: tpu_custom_call.1
= control target key start
LH: loop header
LB: loop body
LE: loop exit
PB: predicated region body
PF: predicated region fallthrough
CT: control target
= control target key end

     0   :  { %11 = vsyncpa [#allocation3], 0  ;;  %s1224_s0 = inlined_call_operand.hbm [shape: bf16[16,128], index: 0, kind: input, shape index: {}]   ;;  %s1225_s1 = inlined_call_operand.hbm [shape: bf16[16,128], index: 1, kind: input, shape index: {}]   ;;  %s1226_s2 = inlined_call_operand.hbm [shape: s32[8,128], index: 2, kind: input, shape index: {}]   ;;  %s1227_s3 = inlined_call_operand.hbm [shape: bf16[128,128], index: 3, kind: input, shape index: {}]   ;;  %s1228_s4 = inlined_call_operand.hbm [shape: bf16[128,128], index: 4, kind: input, shape index: {}]   ;;  %s1229_s5 = inlined_call_operand.vmem [shape: f32[1,128], index: 5, kind: input, shape index: {}]   ;;  %s1230_s6 = inlined_call_operand.hbm [shape: f32[16,128], index: 6, kind: output, shape index: {}]  }
   0x1   :  { %12 = vsyncpa [#allocation6], 0 }
   0x2   :  { %13 = vsyncpa [#allocation9], 0 }
   0x3   :  { %14 = vsyncpa [#allocation4], 0  ;;  %s1074_s21 = smov [#allocation5]   ;;  %s1075_s23 = smov [#allocation8]  }
   0x4   :  { %s32_s22 = sshll.u32 %s1074_s21, 4  ;;  %s54_s24 = sshll.u32 %s1075_s23, 4  ;;  %s33_s22 = int_to_ptr.vmem [resolvable:$true] %s32_s22  ;;  %s55_s24 = int_to_ptr.vmem [resolvable:$true] %s54_s24 }
   0x5   :  { %s954_s25 = scalar_lea.vmem %s33_s22, 128  ;;  %p959_p1 = scmp.lt.s32.totalorder %s33_s22, %s33_s22 }
   0x6   :  { %p955_p0 = scmp.ne.s32.totalorder %s33_s22, %s954_s25  ;;  %p960_p2 = scmp.lt.s32.totalorder %s954_s25, %s954_s25 }
   0x8   :  { %p961_p3 = por %p960_p2, %p959_p1 }
   0xa   :  { %p962_p4 = pnand %p961_p3, %p955_p0 }
   0xc   :  { %965 = shalt.err (!%p962_p4)
}
   0xd   :  { %s1076_s26 = smov 64   ;;  %s1077_s27 = smov 4  }
   0xe   :  { %38 = dma.hbm_to_vmem [thread:$0]  %s1225_s1, 128, %s33_s22, [#allocation6], %s1076_s26, %s1076_s26, %s1077_s27  }
   0xf   :  { %s974_s30 = scalar_lea.vmem %s55_s24, 1024  ;;  %p979_p6 = scmp.lt.s32.totalorder %s55_s24, %s55_s24 }
  0x10   :  { %p975_p5 = scmp.ne.s32.totalorder %s55_s24, %s974_s30  ;;  %p980_p7 = scmp.lt.s32.totalorder %s974_s30, %s974_s30 }
  0x12   :  { %p981_p8 = por %p980_p7, %p979_p6 }
  0x14   :  { %p982_p9 = pnand %p981_p8, %p975_p5 }
  0x16   :  { %985 = shalt.err (!%p982_p9)
}
  0x17   :  { %60 = dma.hbm_to_vmem [thread:$0]  %s1227_s3, 1024, %s55_s24, [#allocation9], %s1076_s26, %s1076_s26, %s1077_s27  }
  0x18   :  { %s1078_s9 = smov [#allocation2]   ;;  %s1079_s11 = smov [#allocation7]  }
  0x19   :  { %s20_s10 = sshll.u32 %s1078_s9, 4  ;;  %s45_s12 = sshll.u32 %s1079_s11, 4  ;;  %s21_s10 = int_to_ptr.vmem [resolvable:$true] %s20_s10  ;;  %s46_s12 = int_to_ptr.vmem [resolvable:$true] %s45_s12 }
  0x1a   :  { %s994_s1 = scalar_lea.vmem %s21_s10, 128  ;;  %p999_p11 = scmp.lt.s32.totalorder %s21_s10, %s21_s10 }
  0x1b   :  { %p995_p10 = scmp.ne.s32.totalorder %s21_s10, %s994_s1  ;;  %p1000_p12 = scmp.lt.s32.totalorder %s994_s1, %s994_s1 }
  0x1d   :  { %p1001_p13 = por %p1000_p12, %p999_p11 }
  0x1f   :  { %p1002_p0 = pnand %p1001_p13, %p995_p10 }
  0x21   :  { %1005 = shalt.err (!%p1002_p0)
}
  0x22   :  { %26 = dma.hbm_to_vmem [thread:$0]  %s1224_s0, 128, %s21_s10, [#allocation3], %s1076_s26, %s1076_s26, %s1077_s27  }
  0x23   :  { %s1014_s3 = scalar_lea.vmem %s46_s12, 128  ;;  %p1019_p2 = scmp.lt.s32.totalorder %s46_s12, %s46_s12 }
  0x24   :  { %p1015_p1 = scmp.ne.s32.totalorder %s46_s12, %s1014_s3  ;;  %p1020_p3 = scmp.lt.s32.totalorder %s1014_s3, %s1014_s3 }
  0x26   :  { %p1021_p4 = por %p1020_p3, %p1019_p2 }
  0x28   :  { %p1022_p5 = pnand %p1021_p4, %p1015_p1 }
  0x2a   :  { %1025 = shalt.err (!%p1022_p5)
}
  0x2b   :  { %48 = dma.hbm_to_vmem [thread:$0]  %s1226_s2, 128, %s46_s12, [#allocation6]  }
  0x2c   :  { %s1080_s17 = smov [#allocation10]  }
  0x2d   :  { %s66_s18 = sshll.u32 %s1080_s17, 4  ;;  %s67_s18 = int_to_ptr.vmem [resolvable:$true] %s66_s18 }
  0x2e   :  { %s1034_s19 = scalar_lea.vmem %s67_s18, 1024  ;;  %p1039_p7 = scmp.lt.s32.totalorder %s67_s18, %s67_s18 }
  0x2f   :  { %p1035_p6 = scmp.ne.s32.totalorder %s67_s18, %s1034_s19  ;;  %p1040_p8 = scmp.lt.s32.totalorder %s1034_s19, %s1034_s19 }
  0x31   :  { %p1041_p9 = por %p1040_p8, %p1039_p7 }
  0x33   :  { %p1042_p10 = pnand %p1041_p9, %p1035_p6 }
  0x35   :  { %1045 = shalt.err (!%p1042_p10)
}
  0x36   :  { %72 = dma.hbm_to_vmem [thread:$0]  %s1228_s4, 1024, %s67_s18, [#allocation9], %s1076_s26, %s1076_s26, %s1077_s27  }
  0x37   :  { %1066 = dma.done.wait [#allocation3], 128  }
  0x38   :  { %1067 = vsyncadd [#allocation3], 4294967168 }
  0x39   :  { %1068 = dma.done.wait [#allocation6], 256  }
  0x3a   :  { %1069 = vsyncadd [#allocation6], 4294967040 }
  0x3b   :  { %1070 = dma.done.wait [#allocation9], 2048  }
  0x3c   :  { %1071 = vsyncadd [#allocation9], 4294965248  ;;  %v98_v0 = vlaneseq  ;;  %v727_v3 = vld [vmem:[#allocation7] ss:$0 sm:$0xff]  ;;  %v1156_v4 = vld [vmem:[#allocation2] sm:$0xff]   ;;  %v1081_v5 = vmov 0.0  }
  0x3d   :  { %818 = vmatprep.subr.bf16.mxu0 %v1156_v4  ;;  %v929_v9 = vld [vmem:[#allocation5] sm:$0xff]   ;;  %v733_v10 = vld [vmem:[#allocation7 + $0x2] ss:$0 sm:$0xff]  ;;  %vm156_vm4 = vcmask 130048   ;;  %vm1082_vm5 = vmmov 0   ;;  %v936_v32 = vld [vmem:[#allocation10 + $0x28] sm:$0xff]  }
  0x3e   :  { %v1149_v1 = vshrl.u32 %v98_v0, 7  ;;  %819 = vmatpush3.bf16.msra.mxu0 %v1156_v4  ;;  %836 = vmatprep.subr.bf16.mxu1 %v929_v9  ;;  %v932_v30 = vld [vmem:[#allocation10 + $0x38] sm:$0xff]   ;;  %v934_v31 = vld [vmem:[#allocation10 + $0x30] sm:$0xff]   ;;  %v938_v33 = vld [vmem:[#allocation10 + $0x20] sm:$0xff]   ;;  %s1084_s21 = smov [#allocation11]  }
  0x3f   :  { %854 = vmatprep.subr.bf16.mxu0 %v1081_v5  ;;  %837 = vmatpush3.bf16.msra.mxu1 %v929_v9  ;;  %v940_v34 = vld [vmem:[#allocation10 + $0x18] sm:$0xff]   ;;  %v942_v35 = vld [vmem:[#allocation10 + $0x10] sm:$0xff]   ;;  %s713_s22 = sshll.u32 %s1084_s21, 4  ;;  %s714_s22 = int_to_ptr.vmem [resolvable:$true] %s713_s22 }
  0x40   :  { %v1152_v2 = vadd.s32 8, %v1149_v1  ;;  %vm105_vm0 = vcmp.eq.s32.totalorder %v1149_v1, %v727_v3  ;;  %874 = vmatprep.subr.bf16.mxu1 %v1081_v5  ;;  %vm127_vm2 = vcmp.eq.s32.totalorder %v1149_v1, %v733_v10  ;;  %s1046_s23 = scalar_lea.vmem %s714_s22, 256  ;;  %p1051_p12 = scmp.lt.s32.totalorder %s714_s22, %s714_s22 }
  0x41   :  { %v728_v6 = vsel %vm105_vm0, 1.0, %v1081_v5  ;;  %v734_v11 = vsel %vm127_vm2, 1.0, %v1081_v5  ;;  %p1047_p11 = scmp.ne.s32.totalorder %s714_s22, %s1046_s23  ;;  %p1052_p13 = scmp.lt.s32.totalorder %s1046_s23, %s1046_s23 }
  0x42   :  { %vm106_vm1 = vcmp.eq.s32.totalorder %v1152_v2, %v727_v3  ;;  %vm128_vm3 = vcmp.eq.s32.totalorder %v1152_v2, %v733_v10 }
  0x43   :  { %v729_v7 = vsel %vm106_vm1, 1.0, %v1081_v5  ;;  %v735_v12 = vsel %vm128_vm3, 1.0, %v1081_v5  ;;  %p1053_p0 = por %p1052_p13, %p1051_p12 }
  0x44   :  { %v111_v8 = vpack.c.bf16 %v729_v7, %v728_v6  ;;  %v133_v13 = vpack.c.bf16 %v735_v12, %v734_v11 }
  0x45   :  { %p1054_p1 = pnand %p1053_p0, %p1047_p11 }
  0x46   :  { %134 = vxpose.xlu0.c.b16.start.end [1/1] (short) %v111_v8, 128 }
  0x63   :  { %278 = vxpose.xlu0.c.b16.start.end [1/1] (short) %v133_v13, 128 }
  0xa8   :  { %v142_v14 = vpop.trf.xlu0 }
  0xa9   :  { %820 = vmatprep.mubr.msk.bf16.mxu0 %vm156_vm4, %v142_v14 }
  0xac   :  { %v143_v15 = vpop.trf.xlu0 }
  0xad   :  { %821 = vmatmul.mubr.msk.bf16.vlgmr.msra.gmra.mxu0 %vm156_vm4, %v143_v15 }
  0xb0   :  { %v144_v16 = vpop.trf.xlu0 }
  0xb1   :  { %824 = vmatprep.mubr.msk.bf16.mxu0 %vm156_vm4, %v144_v16 }
  0xb4   :  { %v145_v17 = vpop.trf.xlu0 }
  0xb5   :  { %825 = vmatmul.mubr.msk.bf16.gmra.mxu0 %vm156_vm4, %v145_v17 }
  0xb8   :  { %v146_v18 = vpop.trf.xlu0 }
  0xb9   :  { %828 = vmatprep.mubr.msk.bf16.mxu0 %vm156_vm4, %v146_v18 }
  0xbc   :  { %v147_v19 = vpop.trf.xlu0 }
  0xbd   :  { %829 = vmatmul.mubr.msk.bf16.gmra.mxu0 %vm156_vm4, %v147_v19 }
  0xc0   :  { %v148_v20 = vpop.trf.xlu0 }
  0xc1   :  { %832 = vmatprep.mubr.msk.bf16.mxu0 %vm156_vm4, %v148_v20 }
  0xc4   :  { %v149_v21 = vpop.trf.xlu0 }
  0xc5   :  { %833 = vmatmul.mubr.msk.bf16.gmra.mxu0 %vm156_vm4, %v149_v21 }
  0xc6   :  { %870 = vmatprep.mubr.msk.bf16.mxu0 %vm1082_vm5, %v1081_v5 }
  0xc8   :  { %v286_v22 = vpop.trf.xlu0 }
  0xc9   :  { %838 = vmatprep.mubr.msk.bf16.mxu1 %vm156_vm4, %v286_v22 }
  0xcc   :  { %v287_v23 = vpop.trf.xlu0 }
  0xcd   :  { %839 = vmatmul.mubr.msk.bf16.vlgmr.msra.gmra.mxu1 %vm156_vm4, %v287_v23 }
  0xce   :  { %875 = vmatpush3.bf16.msra.mxu1 %v932_v30  ;;  %v730_v30 = vld [vmem:[#allocation7 + $0x1] ss:$0 sm:$0xff] }
  0xcf   :  { %876 = vmatprep.subr.bf16.mxu1 %v1081_v5  ;;  %vm116_vm6 = vcmp.eq.s32.totalorder %v1149_v1, %v730_v30  ;;  %vm117_vm7 = vcmp.eq.s32.totalorder %v1152_v2, %v730_v30  ;;  %v935_v1 = vld [vmem:[#allocation8 + $0x20] sm:$0xff]   ;;  %v937_v2 = vld [vmem:[#allocation8 + $0x18] sm:$0xff]  }
  0xd0   :  { %v288_v24 = vpop.trf.xlu0  ;;  %vm754_vm8 = vmpackc.low %vm117_vm7, %vm116_vm6 }
  0xd1   :  { %842 = vmatprep.mubr.msk.bf16.mxu1 %vm156_vm4, %v288_v24 }
  0xd2   :  { %877 = vmatpush3.bf16.msra.mxu1 %v934_v31 }
  0xd3   :  { %878 = vmatprep.subr.bf16.mxu1 %v1081_v5 }
  0xd4   :  { %v289_v25 = vpop.trf.xlu0 }
  0xd5   :  { %843 = vmatmul.mubr.msk.bf16.gmra.mxu1 %vm156_vm4, %v289_v25 }
  0xd6   :  { %879 = vmatpush3.bf16.msra.mxu1 %v936_v32 }
  0xd7   :  { %880 = vmatprep.subr.bf16.mxu1 %v1081_v5 }
  0xd8   :  { %v290_v26 = vpop.trf.xlu0 }
  0xd9   :  { %846 = vmatprep.mubr.msk.bf16.mxu1 %vm156_vm4, %v290_v26 }
  0xda   :  { %881 = vmatpush3.bf16.msra.mxu1 %v938_v33  ;;  %v930_v33 = vld [vmem:[#allocation8 + $0x38] sm:$0xff]  }
  0xdb   :  { %882 = vmatprep.subr.bf16.mxu1 %v1081_v5 }
  0xdc   :  { %v291_v27 = vpop.trf.xlu0 }
  0xdd   :  { %847 = vmatmul.mubr.msk.bf16.gmra.mxu1 %vm156_vm4, %v291_v27 }
  0xde   :  { %883 = vmatpush3.bf16.msra.mxu1 %v940_v34  ;;  %v1083_v34 = vmov 1.0|1.0  }
  0xdf   :  { %884 = vmatprep.subr.bf16.mxu1 %v1081_v5 }
  0xe0   :  { %v292_v28 = vpop.trf.xlu0 }
  0xe1   :  { %850 = vmatprep.mubr.msk.bf16.mxu1 %vm156_vm4, %v292_v28 }
  0xe2   :  { %885 = vmatpush3.bf16.msra.mxu1 %v942_v35  ;;  %v931_v35 = vld [vmem:[#allocation8 + $0x30] sm:$0xff]  }
  0xe3   :  { %886 = vmatprep.subr.bf16.mxu1 %v1081_v5 }
  0xe4   :  { %v293_v29 = vpop.trf.xlu0 }
  0xe5   :  { %851 = vmatmul.mubr.msk.bf16.gmra.mxu1 %vm156_vm4, %v293_v29 }
  0xe6   :  { %890 = vmatprep.mubr.msk.bf16.mxu1 %vm1082_vm5, %v1081_v5 }
 0x16d   :  { %v822_v36 = vpop.f32.mrf.mxu0 }
 0x16f   :  { %v1194_v37 = vpop.f32.mrf.mxu0 }
 0x171   :  { %v823_v38 = vpop.f32.mrf.mxu0 }
 0x173   :  { %v218_v39 = vpop.f32.mrf.mxu0 }
 0x175   :  { %v826_v40 = vpop.f32.mrf.mxu0 }
 0x177   :  { %v231_v41 = vpop.f32.mrf.mxu0 }
 0x179   :  { %v827_v42 = vpop.f32.mrf.mxu0 }
 0x17b   :  { %v234_v43 = vpop.f32.mrf.mxu0 }
 0x17d   :  { %v830_v45 = vpop.f32.mrf.mxu0 }
 0x17f   :  { %v247_v48 = vpop.f32.mrf.mxu0 }
 0x181   :  { %v831_v51 = vpop.f32.mrf.mxu0 }
 0x183   :  { %v250_v54 = vpop.f32.mrf.mxu0 }
 0x185   :  { %v834_v57 = vpop.f32.mrf.mxu0 }
 0x187   :  { %v263_v60 = vpop.f32.mrf.mxu0 }
 0x189   :  { %v835_v63 = vpop.f32.mrf.mxu0 }
 0x18b   :  { %v266_v8 = vpop.f32.mrf.mxu0 }
 0x18d   :  { %v840_v44 = vpop.f32.mrf.mxu1 }
 0x18e   :  { %v423_v27 = vmul.f32 %v840_v44, %v822_v36  ;;  %v933_v36 = vld [vmem:[#allocation8 + $0x28] sm:$0xff]  }
 0x18f   :  { %v358_v46 = vpop.f32.mrf.mxu1 }
 0x190   :  { %v421_v31 = vmul.f32 %v358_v46, %v1194_v37  ;;  %v939_v37 = vld [vmem:[#allocation8 + $0x10] sm:$0xff]  }
 0x191   :  { %v841_v47 = vpop.f32.mrf.mxu1 }
 0x192   :  { %v424_v25 = vmul.f32 %v841_v47, %v823_v38  ;;  %v941_v38 = vld [vmem:[#allocation8 + $0x8] sm:$0xff]  }
 0x193   :  { %v361_v49 = vpop.f32.mrf.mxu1 }
 0x194   :  { %v438_v28 = vpack.c.bf16 %v424_v25, %v423_v27  ;;  %v422_v29 = vmul.f32 %v361_v49, %v218_v39  ;;  %v943_v39 = vld [vmem:[#allocation8] sm:$0xff]  }
 0x195   :  { %v844_v50 = vpop.f32.mrf.mxu1 }
 0x196   :  { %v427_v21 = vmul.f32 %v844_v50, %v826_v40  ;;  %v437_v32 = vpack.c.bf16 %v422_v29, %v421_v31  ;;  %v944_v40 = vld [vmem:[#allocation10 + $0x8] sm:$0xff]  }
 0x197   :  { %v374_v52 = vpop.f32.mrf.mxu1  ;;  %887 = vmatpush3.bf16.msra.mxu1 %v944_v40 }
 0x198   :  { %v425_v24 = vmul.f32 %v374_v52, %v231_v41  ;;  %888 = vmatprep.subr.bf16.mxu1 %v1081_v5  ;;  %v945_v41 = vld [vmem:[#allocation10] sm:$0xff]  }
 0x199   :  { %v845_v53 = vpop.f32.mrf.mxu1 }
 0x19a   :  { %v428_v19 = vmul.f32 %v845_v53, %v827_v42 }
 0x19b   :  { %v377_v55 = vpop.f32.mrf.mxu1  ;;  %889 = vmatpush3.bf16.msra.mxu1 %v945_v41 }
 0x19c   :  { %v440_v22 = vpack.c.bf16 %v428_v19, %v427_v21  ;;  %v426_v23 = vmul.f32 %v377_v55, %v234_v43 }
 0x19d   :  { %v848_v56 = vpop.f32.mrf.mxu1 }
 0x19e   :  { %v431_v15 = vmul.f32 %v848_v56, %v830_v45  ;;  %v439_v26 = vpack.c.bf16 %v426_v23, %v425_v24 }
 0x19f   :  { %v390_v58 = vpop.f32.mrf.mxu1 }
 0x1a0   :  { %v429_v18 = vmul.f32 %v390_v58, %v247_v48 }
 0x1a1   :  { %v849_v59 = vpop.f32.mrf.mxu1 }
 0x1a2   :  { %v432_v13 = vmul.f32 %v849_v59, %v831_v51 }
 0x1a3   :  { %v393_v61 = vpop.f32.mrf.mxu1 }
 0x1a4   :  { %v442_v16 = vpack.c.bf16 %v432_v13, %v431_v15  ;;  %v430_v17 = vmul.f32 %v393_v61, %v250_v54 }
 0x1a5   :  { %v852_v62 = vpop.f32.mrf.mxu1 }
 0x1a6   :  { %v435_v6 = vmul.f32 %v852_v62, %v834_v57  ;;  %v441_v20 = vpack.c.bf16 %v430_v17, %v429_v18 }
 0x1a7   :  { %v406_v0 = vpop.f32.mrf.mxu1 }
 0x1a8   :  { %v433_v12 = vmul.f32 %v406_v0, %v263_v60 }
 0x1a9   :  { %v853_v3 = vpop.f32.mrf.mxu1 }
 0x1aa   :  { %v436_v7 = vmul.f32 %v853_v3, %v835_v63 }
 0x1ab   :  { %v409_v9 = vpop.f32.mrf.mxu1 }
 0x1ac   :  { %v444_v10 = vpack.c.bf16 %v436_v7, %v435_v6  ;;  %v434_v11 = vmul.f32 %v409_v9, %v266_v8 }
 0x1ae   :  { %855 = vmatpush3.bf16.msra.mxu0 %v444_v10  ;;  %v443_v14 = vpack.c.bf16 %v434_v11, %v433_v12 }
 0x1af   :  { %856 = vmatprep.subr.bf16.mxu0 %v1081_v5 }
 0x1b2   :  { %857 = vmatpush3.bf16.msra.mxu0 %v443_v14 }
 0x1b3   :  { %858 = vmatprep.subr.bf16.mxu0 %v1081_v5 }
 0x1b6   :  { %859 = vmatpush3.bf16.msra.mxu0 %v442_v16 }
 0x1b7   :  { %860 = vmatprep.subr.bf16.mxu0 %v1081_v5 }
 0x1ba   :  { %861 = vmatpush3.bf16.msra.mxu0 %v441_v20 }
 0x1bb   :  { %862 = vmatprep.subr.bf16.mxu0 %v1081_v5 }
 0x1be   :  { %863 = vmatpush3.bf16.msra.mxu0 %v440_v22 }
 0x1bf   :  { %864 = vmatprep.subr.bf16.mxu0 %v1081_v5 }
 0x1c2   :  { %865 = vmatpush3.bf16.msra.mxu0 %v439_v26 }
 0x1c3   :  { %866 = vmatprep.subr.bf16.mxu0 %v1081_v5 }
 0x1c6   :  { %867 = vmatpush3.bf16.msra.mxu0 %v438_v28 }
 0x1c7   :  { %868 = vmatprep.subr.bf16.mxu0 %v1081_v5 }
 0x1ca   :  { %869 = vmatpush3.bf16.msra.mxu0 %v437_v32 }
 0x1cb   :  { %894 = vmatprep.subr.bf16.mxu0 %v1081_v5 }
 0x1cd   :  { %871 = vmatmul.mubr.msk.bf16.vlgmr.msra.gmra.mxu0 %vm754_vm8, %v1083_v34 }
 0x1ce   :  { %895 = vmatpush3.bf16.msra.mxu0 %v930_v33  ;;  %910 = vmatprep.mubr.msk.bf16.mxu0 %vm1082_vm5, %v1081_v5 }
 0x1cf   :  { %896 = vmatprep.subr.bf16.mxu0 %v1081_v5 }
 0x1d2   :  { %897 = vmatpush3.bf16.msra.mxu0 %v931_v35 }
 0x1d3   :  { %898 = vmatprep.subr.bf16.mxu0 %v1081_v5 }
 0x1d6   :  { %899 = vmatpush3.bf16.msra.mxu0 %v933_v36 }
 0x1d7   :  { %900 = vmatprep.subr.bf16.mxu0 %v1081_v5 }
 0x1da   :  { %901 = vmatpush3.bf16.msra.mxu0 %v935_v1 }
 0x1db   :  { %902 = vmatprep.subr.bf16.mxu0 %v1081_v5 }
 0x1de   :  { %903 = vmatpush3.bf16.msra.mxu0 %v937_v2 }
 0x1df   :  { %904 = vmatprep.subr.bf16.mxu0 %v1081_v5 }
 0x1e2   :  { %905 = vmatpush3.bf16.msra.mxu0 %v939_v37 }
 0x1e3   :  { %906 = vmatprep.subr.bf16.mxu0 %v1081_v5 }
 0x1e6   :  { %907 = vmatpush3.bf16.msra.mxu0 %v941_v38 }
 0x1e7   :  { %908 = vmatprep.subr.bf16.mxu0 %v1081_v5 }
 0x1ea   :  { %909 = vmatpush3.bf16.msra.mxu0 %v943_v39 }
 0x1ed   :  { %911 = vmatmul.mubr.bf16.vlgmr.msra.gmra.mxu0 %v1156_v4  ;;  %v772_v4 = vld [vmem:[%s1229_s5] ss:$0 sm:$0xff] }
 0x28d   :  { %v479_v42 = vpop.f32.mrf.mxu0 }
 0x28f   :  { %v872_v43 = vpop.f32.mrf.mxu0 }
 0x291   :  { %v482_v44 = vpop.f32.mrf.mxu0 }
 0x292   :  { %v502_v45 = vpack.c.bf16 %v482_v44, %v479_v42 }
 0x293   :  { %v873_v46 = vpop.f32.mrf.mxu0 }
 0x294   :  { %891 = vmatmul.mubr.bf16.vlgmr.msra.gmra.mxu1 %v502_v45 }
 0x2ad   :  { %v690_v47 = vpop.f32.mrf.mxu0 }
 0x2af   :  { %v912_v48 = vpop.f32.mrf.mxu0 }
 0x2b1   :  { %v693_v49 = vpop.f32.mrf.mxu0 }
 0x2b3   :  { %v913_v50 = vpop.f32.mrf.mxu0 }
 0x354   :  { %v601_v51 = vpop.f32.mrf.mxu1 }
 0x355   :  { %v691_v52 = vadd.f32 %v690_v47, %v601_v51 }
 0x356   :  { %v892_v53 = vpop.f32.mrf.mxu1 }
 0x357   :  { %v704_v5 = vadd.f32 %v772_v4, %v691_v52 }
 0x358   :  { %v604_v54 = vpop.f32.mrf.mxu1 }
 0x359   :  { %706 = vst [vmem:[#allocation11] sm:$0xff] %v704_v5  ;;  %v694_v55 = vadd.f32 %v693_v49, %v604_v54 }
 0x35a   :  { %v893_v56 = vpop.f32.mrf.mxu1 }
 0x35b   :  { %v705_v57 = vadd.f32 %v772_v4, %v694_v55 }
 0x35d   :  { %707 = vst [vmem:[#allocation11 + $0x8] sm:$0xff] %v705_v57 }
 0x35e   :  { %1057 = shalt.err (!%p1054_p1)
}
 0x35f   :  { %s1085_s5 = smov 128   ;;  %s1086_s24 = smov 8  }
 0x360   :  { %719 = dma.vmem_to_hbm [thread:$0]  %s714_s22, 256, %s1230_s6, [#allocation4], %s1085_s5, %s1085_s5, %s1086_s24  }
 0x361   :  { %1072 = dma.done.wait [#allocation4], 256  }
 0x362   :  { %1073 = vsyncadd [#allocation4], 4294967040 }
 0x363   :  { %723 = vsyncpa [#allocation3], 1 }
 0x364   :  { %724 = vsyncpa [#allocation6], 1 }
 0x365   :  { %725 = vsyncpa [#allocation9], 1 }
 0x366   :  { %726 = vsyncpa [#allocation4], 1 }

</bundles_post_ra>
